<compile_context>
chip_gen: v5e
topology: v5e:2x2
jax: 0.10.0
libtpu: 0.0.40
codegen_flags: <defaults>
</compile_context>

<pallas_src>
import functools
import math

import jax
import jax.numpy as jnp
from jax.experimental import pallas as pl
from jax.experimental.pallas import tpu as pltpu


def _choose_tile(n, candidates=(512, 256, 128)):
    """Largest candidate tile that evenly divides n; else the full extent."""
    for t in candidates:
        if n >= t and n % t == 0:
            return t
    return n


# ---------------------------------------------------------------------------
# Kernel 1: fused QKV projection   (row tile of x) @ (D, 3D) -> (row tile, 3D)
# ---------------------------------------------------------------------------
def _qkv_proj_kernel(x_ref, w_ref, o_ref):
    o_ref[...] = jnp.dot(
        x_ref[...], w_ref[...], preferred_element_type=jnp.float32
    ).astype(o_ref.dtype)


def _qkv_projection(x2d, w_qkv):
    n_rows, d = x2d.shape
    n_out = w_qkv.shape[1]
    rt = _choose_tile(n_rows)
    return pl.pallas_call(
        _qkv_proj_kernel,
        out_shape=jax.ShapeDtypeStruct((n_rows, n_out), jnp.bfloat16),
        grid=(n_rows // rt,),
        in_specs=[
            pl.BlockSpec((rt, d), lambda r: (r, 0)),
            # Constant index map: the weight block never changes, so it is
            # only fetched once across the whole grid.
            pl.BlockSpec((d, n_out), lambda r: (0, 0)),
        ],
        out_specs=pl.BlockSpec((rt, n_out), lambda r: (r, 0)),
        compiler_params=pltpu.CompilerParams(
            dimension_semantics=("parallel",),
            vmem_limit_bytes=32 * 1024 * 1024,
        ),
    )(x2d, w_qkv)


# ---------------------------------------------------------------------------
# Kernel 2: flash-style attention (online softmax) + fused output projection
# ---------------------------------------------------------------------------
def _flash_mha_kernel(q_ref, k_ref, v_ref, wp_ref, o_ref,
                      m_sc, l_sc, acc_sc, *, n_heads):
    ki = pl.program_id(2)

    @pl.when(ki == 0)
    def _():
        m_sc[...] = jnp.full(m_sc.shape, -jnp.inf, dtype=m_sc.dtype)
        l_sc[...] = jnp.zeros(l_sc.shape, dtype=l_sc.dtype)
        acc_sc[...] = jnp.zeros(acc_sc.shape, dtype=acc_sc.dtype)

    q = q_ref[0]          # (H, Tq, dh) bf16; 1/sqrt(dh) already folded into Wq
    k = k_ref[0]          # (H, Tk, dh) bf16
    v = v_ref[0]          # (H, Tk, dh) bf16

    # Scores for all heads at once; contraction over dh on the MXU, no
    # explicit transpose of K.
    s = jnp.einsum("hqd,hkd->hqk", q, k,
                   preferred_element_type=jnp.float32)            # (H, Tq, Tk)

    m_prev = m_sc[...]                                            # (H, Tq, 1)
    m_new = jnp.maximum(m_prev, s.max(axis=-1, keepdims=True))
    alpha = jnp.exp(m_prev - m_new)
    p = jnp.exp(s - m_new)                                        # unnormalized
    l_sc[...] = alpha * l_sc[...] + p.sum(axis=-1, keepdims=True)
    acc_sc[...] = alpha * acc_sc[...] + jnp.einsum(
        "hqk,hkd->hqd", p.astype(v.dtype), v,
        preferred_element_type=jnp.float32)
    m_sc[...] = m_new

    @pl.when(ki == pl.num_programs(2) - 1)
    def _():
        # Normalize once at finalize; approx reciprocal runs on the EUP slot.
        inv_l = pl.reciprocal(l_sc[...], approx=True)             # (H, Tq, 1)
        head_out = (acc_sc[...] * inv_l).astype(wp_ref.dtype)     # (H, Tq, dh)
        # Fused output projection: out = sum_h head_out[h] @ Wp[h].
        # This replaces torch's cat-over-heads + (T, D) @ (D, D) and needs no
        # in-kernel concatenate or lane shuffles (head index is a leading dim).
        acc = jnp.dot(head_out[0], wp_ref[0],
                      preferred_element_type=jnp.float32)
        for hh in range(1, n_heads):
            acc = acc + jnp.dot(head_out[hh], wp_ref[hh],
                                preferred_element_type=jnp.float32)
        o_ref[0] = acc.astype(o_ref.dtype)


def mha_forward(x, wq, wk, wv, wp, h):
    """x: (B, T, D) float32; weights (D, D) float32. Returns (B, T, D) f32."""
    B, T, D = x.shape
    assert D % h == 0
    dh = D // h
    bf16 = jnp.bfloat16

    # Fold the 1/sqrt(dh) score scale into Wq and fuse the three projections.
    scale = 1.0 / math.sqrt(float(dh))
    w_qkv = jnp.concatenate([wq * scale, wk, wv], axis=1).astype(bf16)  # (D,3D)

    qkv = _qkv_projection(x.reshape(B * T, D).astype(bf16), w_qkv)  # (B*T, 3D)

    # Head-major (B, H, T, dh) layout for the attention kernel (XLA transpose).
    def _heads(a):
        return a.reshape(B, T, h, dh).transpose(0, 2, 1, 3)

    q = _heads(qkv[:, :D])
    k = _heads(qkv[:, D:2 * D])
    v = _heads(qkv[:, 2 * D:])
    wp_h = wp.reshape(h, dh, D).astype(bf16)                        # (H, dh, D)

    tq = _choose_tile(T)
    tk = _choose_tile(T)
    grid = (B, T // tq, T // tk)

    kernel = functools.partial(_flash_mha_kernel, n_heads=h)
    q_spec = pl.BlockSpec((1, h, tq, dh), lambda b, qi, ki: (b, 0, qi, 0))
    kv_spec = pl.BlockSpec((1, h, tk, dh), lambda b, qi, ki: (b, 0, ki, 0))

    return pl.pallas_call(
        kernel,
        out_shape=jax.ShapeDtypeStruct((B, T, D), jnp.float32),
        grid=grid,
        in_specs=[
            q_spec,
            kv_spec,
            kv_spec,
            pl.BlockSpec((h, dh, D), lambda b, qi, ki: (0, 0, 0)),
        ],
        out_specs=pl.BlockSpec((1, tq, D), lambda b, qi, ki: (b, qi, 0)),
        scratch_shapes=[
            pltpu.VMEM((h, tq, 1), jnp.float32),   # running max  m
            pltpu.VMEM((h, tq, 1), jnp.float32),   # running sum  l
            pltpu.VMEM((h, tq, dh), jnp.float32),  # running acc  (p @ v)
        ],
        compiler_params=pltpu.CompilerParams(
            dimension_semantics=("parallel", "parallel", "arbitrary"),
            vmem_limit_bytes=32 * 1024 * 1024,
        ),
    )(q, k, v, wp_h)


# ---------------------------------------------------------------------------
# References
# ---------------------------------------------------------------------------
def mha_reference_f32(x, wq, wk, wv, wp, h):
    """Plain-JAX float32 mirror of the PyTorch module forward."""
    B, T, D = x.shape
    dh = D // h
    q = (x @ wq).reshape(B, T, h, dh).transpose(0, 2, 1, 3)
    k = (x @ wk).reshape(B, T, h, dh).transpose(0, 2, 1, 3)
    v = (x @ wv).reshape(B, T, h, dh).transpose(0, 2, 1, 3)
    s = (q @ jnp.swapaxes(k, -1, -2)) / math.sqrt(dh)
    p = jax.nn.softmax(s, axis=-1)
    o = (p @ v).transpose(0, 2, 1, 3).reshape(B, T, D)
    return o @ wp


def mha_reference_bf16(x, wq, wk, wv, wp, h):
    """Same op structure as the module forward, but mirroring the kernel's
    numerics (bf16 MXU operands, f32 accumulation) for a tight check."""
    B, T, D = x.shape
    dh = D // h
    bf16 = jnp.bfloat16
    scale = 1.0 / math.sqrt(float(dh))
    w_qkv = jnp.concatenate([wq * scale, wk, wv], axis=1).astype(bf16)
    qkv = jnp.dot(x.reshape(B * T, D).astype(bf16), w_qkv,
                  preferred_element_type=jnp.float32).astype(bf16)

    def heads(a):
        return a.reshape(B, T, h, dh).transpose(0, 2, 1, 3)

    q, k, v = heads(qkv[:, :D]), heads(qkv[:, D:2 * D]), heads(qkv[:, 2 * D:])
    s = jnp.einsum("bhqd,bhkd->bhqk", q, k, preferred_element_type=jnp.float32)
    p = jax.nn.softmax(s, axis=-1)
    o = jnp.einsum("bhqk,bhkd->bhqd", p.astype(bf16), v,
                   preferred_element_type=jnp.float32).astype(bf16)
    wp_h = wp.reshape(h, dh, D).astype(bf16)
    return jnp.einsum("bhqd,hde->bqe", o, wp_h,
                      preferred_element_type=jnp.float32)


if __name__ == "__main__":
    # Small shapes consistent with the module: d_model=32, h=4, max_tokens=8, B=2
    B, T, D, H = 2, 8, 32, 4

    key = jax.random.PRNGKey(0)
    kx, kq, kk, kv, kp = jax.random.split(key, 5)
    x = jax.random.normal(kx, (B, T, D), dtype=jnp.float32)
    wq = jax.random.normal(kq, (D, D), dtype=jnp.float32)
    wk = jax.random.normal(kk, (D, D), dtype=jnp.float32)
    wv = jax.random.normal(kv, (D, D), dtype=jnp.float32)
    wp = jax.random.normal(kp, (D, D), dtype=jnp.float32)

    out = jax.block_until_ready(mha_forward(x, wq, wk, wv, wp, H))
    assert out.shape == (B, T, D)

    # Compare against the matched-precision (bf16-operand) reference; the
    # kernel intentionally computes in bf16 with f32 accumulation per the
    # performance review, so the pure-f32 reference only agrees to bf16-level
    # precision.
    ref = mha_reference_bf16(x, wq, wk, wv, wp, H)
    assert jnp.allclose(out, ref, atol=5e-1, rtol=5e-2), \
        "mismatch vs matched-precision reference"

    print("KERNEL_OK")
</pallas_src>

<mosaic_0001>
module attributes {stable_mosaic.version = 11 : i64} {
  func.func @_qkv_proj_kernel(%arg0: i32, %arg1: memref<16x32xbf16, #tpu.memory_space<vmem>>, %arg2: memref<32x96xbf16, #tpu.memory_space<vmem>>, %arg3: memref<16x96xbf16, #tpu.memory_space<vmem>>) attributes {dimension_semantics = [#tpu.dimension_semantics<parallel>], iteration_bounds = array<i64: 1>, scalar_prefetch = 0 : i64, scratch_operands = 0 : i64, tpu.core_type = #tpu.core_type<tc>, window_params = [{transform_indices = @transform_0, window_bounds = array<i64: 16, 32>}, {pipeline_mode = #tpu.pipeline_mode<synchronous>, transform_indices = @transform_1, window_bounds = array<i64: 32, 96>}, {transform_indices = @transform_2, window_bounds = array<i64: 16, 96>}]} {
    %c0 = arith.constant 0 : index
    %c0_0 = arith.constant 0 : index
    %0 = vector.load %arg1[%c0, %c0_0] : memref<16x32xbf16, #tpu.memory_space<vmem>>, vector<16x32xbf16>
    %c0_1 = arith.constant 0 : index
    %c0_2 = arith.constant 0 : index
    %1 = vector.load %arg2[%c0_1, %c0_2] : memref<32x96xbf16, #tpu.memory_space<vmem>>, vector<32x96xbf16>
    %cst = arith.constant dense<0.000000e+00> : vector<16x96xf32>
    %2 = tpu.matmul %0, %1, %cst {dimension_numbers = #tpu.dot_dimension_numbers<[1], [0], [0], [1], [0, 0, 1, 1], [], []>} : vector<16x32xbf16>, vector<32x96xbf16>, vector<16x96xf32> -> vector<16x96xf32>
    %3 = arith.truncf %2 : vector<16x96xf32> to vector<16x96xbf16>
    %c0_3 = arith.constant 0 : index
    %c0_4 = arith.constant 0 : index
    %4 = vector.load %arg3[%c0_3, %c0_4] : memref<16x96xbf16, #tpu.memory_space<vmem>>, vector<16x96xbf16>
    tpu.vector_store %arg3[%c0_3, %c0_4], %3 {strides = array<i32>} : memref<16x96xbf16, #tpu.memory_space<vmem>>, vector<16x96xbf16>,
    return
  }
  func.func @transform_0(%arg0: i32) -> (i32, i32) {
    %c0_i32 = arith.constant 0 : i32
    %c0_i32_0 = arith.constant 0 : i32
    return %arg0, %c0_i32 : i32, i32
  }
  func.func @transform_1(%arg0: i32) -> (i32, i32) {
    %c0_i32 = arith.constant 0 : i32
    %c0_i32_0 = arith.constant 0 : i32
    %c0_i32_1 = arith.constant 0 : i32
    return %c0_i32, %c0_i32_0 : i32, i32
  }
  func.func @transform_2(%arg0: i32) -> (i32, i32) {
    %c0_i32 = arith.constant 0 : i32
    %c0_i32_0 = arith.constant 0 : i32
    return %arg0, %c0_i32 : i32, i32
  }
}

</mosaic_0001>

<bundles_post_ra>
// kernel: tpu_custom_call.1
= control target key start
LH: loop header
LB: loop body
LE: loop exit
PB: predicated region body
PF: predicated region fallthrough
CT: control target
= control target key end

     0   :  { %7 = vsyncpa [#allocation3], 0  ;;  %s248_s0 = inlined_call_operand.hbm [shape: bf16[16,32], index: 0, kind: input, shape index: {}]   ;;  %s249_s1 = inlined_call_operand.hbm [shape: bf16[32,96], index: 1, kind: input, shape index: {}]   ;;  %s250_s2 = inlined_call_operand.hbm [shape: bf16[16,96], index: 2, kind: output, shape index: {}]  }
   0x1   :  { %8 = vsyncpa [#allocation6], 0 }
   0x2   :  { %9 = vsyncpa [#allocation4], 0  ;;  %s14_s11 = sshll.u32 %s248_s0, 4  ;;  %s210_s12 = smov [#allocation2]   ;;  %s15_s11 = int_to_ptr.hbm [resolvable:$true] %s14_s11 }
   0x3   :  { %s16_s13 = sshll.u32 %s210_s12, 4  ;;  %s27_s16 = sshll.u32 %s249_s1, 4  ;;  %s17_s13 = int_to_ptr.vmem [resolvable:$true] %s16_s13  ;;  %s28_s16 = int_to_ptr.hbm [resolvable:$true] %s27_s16 }
   0x4   :  { %s211_s17 = smov 64   ;;  %s212_s18 = smov 4  }
   0x5   :  { %22 = dma.hbm_to_vmem [thread:$0]  %s15_s11, 128, %s17_s13, [#allocation3], %s211_s17, %s211_s17, %s212_s18  }
   0x6   :  { %s213_s19 = smov [#allocation5]  }
   0x7   :  { %s29_s20 = sshll.u32 %s213_s19, 4  ;;  %s30_s20 = int_to_ptr.vmem [resolvable:$true] %s29_s20 }
   0x8   :  { %35 = dma.hbm_to_vmem [thread:$0]  %s28_s16, 256, %s30_s20, [#allocation6], %s211_s17, %s211_s17, %s212_s18  }
   0x9   :  { %204 = dma.done.wait [#allocation3], 128  }
   0xa   :  { %205 = vsyncadd [#allocation3], 4294967168 }
   0xb   :  { %206 = dma.done.wait [#allocation6], 256  }
   0xc   :  { %207 = vsyncadd [#allocation6], 4294967040  ;;  %v126_v0 = vld [vmem:[#allocation5 + $0x8] sm:$0xff]  ;;  %v125_v1 = vld [vmem:[#allocation5] sm:$0xff]  ;;  %vm68_vm0 = vcmask 261120   ;;  %vm88_vm1 = vcmask 781312  }
   0xd   :  { %78 = vmatpush.bf16.msra.mxu0 %v126_v0  ;;  %v124_v2 = vld [vmem:[#allocation2] sm:$0xff]  ;;  %s214_s0 = smov [#allocation7]   ;;  %s97_s23 = sshll.u32 %s250_s2, 4  ;;  %s98_s23 = int_to_ptr.hbm [resolvable:$true] %s97_s23 }
   0xe   :  { %s95_s1 = sshll.u32 %s214_s0, 4  ;;  %s96_s1 = int_to_ptr.vmem [resolvable:$true] %s95_s1 }
  0x11   :  { %79 = vmatpush.bf16.msra.mxu0 %v125_v1 }
  0x14   :  { %123 = vmatmul.msk.bf16.vlgmr.msra.gmra.mxu0 %vm68_vm0, %v124_v2 }
  0x91   :  { %v81_v3 = vpop.f32.mrf.mxu0 }
  0x92   :  { %v86_v4 = vpack.c.bf16 %v81_v3, %v81_v3 }
  0x94   :  { %89 = vst.msk [vmem:[#allocation7] sm:$0xf] %vm88_vm1, %v86_v4 }
  0x99   :  { %v83_v5 = vpop.f32.mrf.mxu0 }
  0x9a   :  { %v87_v6 = vpack.c.bf16 %v83_v5, %v83_v5 }
  0x9c   :  { %90 = vst.msk [vmem:[#allocation7 + $0x4] sm:$0xf] %vm88_vm1, %v87_v6 }
  0x9d   :  { %103 = dma.vmem_to_hbm [thread:$0]  %s96_s1, 128, %s98_s23, [#allocation4], %s211_s17, %s211_s17, %s212_s18  }
  0x9e   :  { %208 = dma.done.wait [#allocation4], 128  }
  0x9f   :  { %209 = vsyncadd [#allocation4], 4294967168 }
  0xa0   :  { %108 = vsyncpa [#allocation3], 1 }
  0xa1   :  { %109 = vsyncpa [#allocation6], 1 }
  0xa2   :  { %110 = vsyncpa [#allocation4], 1 }

</bundles_post_ra>
